<compile_context>
chip_gen: v6e
topology: v6e:2x2x1
jax: 0.10.0
libtpu: 0.0.40
codegen_flags: <defaults>
</compile_context>

<pallas_src>
import numpy as np
import jax
import jax.numpy as jnp
from jax.experimental import pallas as pl
from jax.experimental.pallas import tpu as pltpu


def _bilinear_matrix(in_size: int, out_size: int) -> np.ndarray:
    """F.interpolate(mode='bilinear', align_corners=False) along one axis."""
    scale = in_size / out_size
    U = np.zeros((out_size, in_size), dtype=np.float64)
    for o in range(out_size):
        src = scale * (o + 0.5) - 0.5
        if src < 0.0:
            src = 0.0
        i0 = min(int(np.floor(src)), in_size - 1)
        i1 = min(i0 + 1, in_size - 1)
        lam = src - i0
        U[o, i0] += 1.0 - lam
        U[o, i1] += lam
    return U


def _pick_nb(N: int) -> int:
    # Keep grid length >= 2 whenever N >= 2 so the "parallel" batch axis can be
    # sharded across v7x's 2 TensorCores (an idle core costs far more than the
    # ~0.35us/step overhead that batch folding amortizes). Beyond that, fold
    # batch to reduce step count on single-TC chips.
    if N <= 1:
        return 1
    best = 1
    for d in range(1, min(N, 8) + 1):
        if N % d == 0 and N // d >= 2:
            best = d
    return best


def _make_kernel(NB: int, CW: int, inv_n: float):
    def kernel(x_ref, m_ref, v_ref, b_ref, o_ref):
        mcat = m_ref[...]          # (W*C_in, 3*CW)  fused width-upsample + conv taps
        bsel = b_ref[...]          # (CW, CW) same-channel block-indicator matrix

        for nb in range(NB):
            x = x_ref[nb]          # (H, W*C_in) lanes = w*C_in + cin

            # ---- upsample x2 + 3x3 'same' conv as 4 lane-dense matmuls ------
            # acc[oh, cout*OW+ow] = sum_dh (V[dh] @ x @ M[dh])[oh, cout*OW+ow]
            t = jnp.dot(x, mcat, preferred_element_type=jnp.float32)   # (H, 3*CW)
            acc = jnp.dot(v_ref[0], t[:, 0 * CW:1 * CW],
                          preferred_element_type=jnp.float32)
            acc = acc + jnp.dot(v_ref[1], t[:, 1 * CW:2 * CW],
                                preferred_element_type=jnp.float32)
            acc = acc + jnp.dot(v_ref[2], t[:, 2 * CW:3 * CW],
                                preferred_element_type=jnp.float32)    # (OH, CW)
            # Conv bias omitted: InstanceNorm's mean subtraction cancels it.

            # ---- InstanceNorm2d (two-pass, biased var, eps=1e-5) + ReLU -----
            # acc @ Bsel sums lanes within each channel block; the sublane sum
            # finishes the spatial reduction, already broadcast over lanes.
            mean = jnp.sum(jnp.dot(acc, bsel, preferred_element_type=jnp.float32),
                           axis=0, keepdims=True) * inv_n              # (1, CW)
            d = acc - mean
            var = jnp.sum(jnp.dot(d * d, bsel, preferred_element_type=jnp.float32),
                          axis=0, keepdims=True) * inv_n               # (1, CW)
            o_ref[nb] = jnp.maximum(d * jax.lax.rsqrt(var + 1e-5), 0.0)

    return kernel


def hm_upsamp_block(x_nchw, conv_w, conv_b):
    """Pallas implementation of HmUpsampBlock.forward.  x_nchw: (N, 2C, H, W)."""
    del conv_b  # cancels exactly under InstanceNorm's mean subtraction
    N, C2, H, W = x_nchw.shape
    C = conv_w.shape[0]
    assert C2 == 2 * C and conv_w.shape == (C, C2, 3, 3)
    OH, OW = 2 * H, 2 * W
    KW = W * C2            # input lanes per row  (= 128 for W=16, C2=8)
    CW = C * OW            # output lanes per row (= 128 for OW=32, C=4)
    inv_n = 1.0 / float(OH * OW)

    # ---- constants (tiny, precomputed in f64, cast to f32) ------------------
    Uh = _bilinear_matrix(H, OH)                         # (OH, H)
    Uw = _bilinear_matrix(W, OW)                         # (OW, W)
    Uh_pad = np.zeros((OH + 2, H))
    Uh_pad[1:OH + 1] = Uh                                # conv height zero-pad baked in
    V = np.stack([Uh_pad[dh:dh + OH, :] for dh in range(3)]).astype(np.float32)
    Uw_pad = np.zeros((OW + 2, W))
    Uw_pad[1:OW + 1] = Uw                                # conv width zero-pad baked in

    # M[dh][w*C_in+cin, cout*OW+ow] = sum_dw Uw_pad[ow+dw, w] * conv_w[cout,cin,dh,dw]
    w_np = np.asarray(conv_w, np.float64)
    M = np.zeros((3, KW, CW))
    for dh in range(3):
        for dw in range(3):
            A = Uw_pad[dw:dw + OW, :].T                  # (W, OW): A[w,ow] = Uw_pad[ow+dw,w]
            Wk = w_np[:, :, dh, dw]                      # (C_out, C_in)
            M[dh] += np.einsum('wo,ki->wiko', A, Wk).reshape(KW, CW)
    Mcat = np.concatenate([M[0], M[1], M[2]], axis=1).astype(np.float32)  # (KW, 3*CW)

    # Same-channel block-indicator for InstanceNorm lane reductions/broadcasts.
    Bsel = np.zeros((CW, CW), np.float32)
    for c in range(C):
        Bsel[c * OW:(c + 1) * OW, c * OW:(c + 1) * OW] = 1.0

    # NCHW -> (N, H, W*C_in) : rows = h, lanes = w*C_in + cin (one XLA transpose).
    xr = jnp.transpose(x_nchw, (0, 2, 3, 1)).reshape(N, H, KW).astype(jnp.float32)

    NB = _pick_nb(N)
    kernel = _make_kernel(NB, CW, inv_n)
    out = pl.pallas_call(
        kernel,
        out_shape=jax.ShapeDtypeStruct((N, OH, CW), jnp.float32),
        grid_spec=pltpu.PrefetchScalarGridSpec(
            num_scalar_prefetch=0,
            grid=(N // NB,),
            in_specs=[
                pl.BlockSpec((NB, H, KW), lambda n: (n, 0, 0)),      # x
                pl.BlockSpec((KW, 3 * CW), lambda n: (0, 0)),        # fused conv weights
                pl.BlockSpec((3, OH, H), lambda n: (0, 0, 0)),       # height-upsample taps
                pl.BlockSpec((CW, CW), lambda n: (0, 0)),            # channel-block matrix
            ],
            out_specs=pl.BlockSpec((NB, OH, CW), lambda n: (n, 0, 0)),
        ),
        compiler_params=pltpu.CompilerParams(
            dimension_semantics=("parallel",)),
    )(xr, jnp.asarray(Mcat), jnp.asarray(V), jnp.asarray(Bsel))

    # (N, OH, C*OW) with lanes = cout*OW + ow  ->  NCHW.
    return jnp.transpose(out.reshape(N, OH, C, OW), (0, 2, 1, 3))


def reference(x, w, b):
    """Pure-JAX reference matching the PyTorch forward."""
    N, C2, H, W = x.shape
    OH, OW = 2 * H, 2 * W
    Uh = jnp.asarray(_bilinear_matrix(H, OH), jnp.float32)
    Uw = jnp.asarray(_bilinear_matrix(W, OW), jnp.float32)
    up = jnp.einsum('ph,nchw->ncpw', Uh, x)
    up = jnp.einsum('qw,ncpw->ncpq', Uw, up)
    y = jax.lax.conv_general_dilated(
        up, w, window_strides=(1, 1), padding=((1, 1), (1, 1)),
        dimension_numbers=('NCHW', 'OIHW', 'NCHW'))
    y = y + b[None, :, None, None]
    mean = jnp.mean(y, axis=(2, 3), keepdims=True)
    var = jnp.mean((y - mean) ** 2, axis=(2, 3), keepdims=True)
    y = (y - mean) * jax.lax.rsqrt(var + 1e-5)
    return jnp.maximum(y, 0.0)


if __name__ == "__main__":
    key = jax.random.PRNGKey(0)
    kx, kw, kb = jax.random.split(key, 3)

    # HmUpsampBlock(channels=4): input has channels*2 = 8 channels.
    N, C, H, W = 2, 4, 16, 16
    C2 = 2 * C
    x = jax.random.normal(kx, (N, C2, H, W), dtype=jnp.float32)
    conv_w = jax.random.normal(kw, (C, C2, 3, 3), dtype=jnp.float32) / np.sqrt(C2 * 9)
    conv_b = 0.1 * jax.random.normal(kb, (C,), dtype=jnp.float32)

    out = jax.block_until_ready(hm_upsamp_block(x, conv_w, conv_b))

    assert out.shape == (N, C, 2 * H, 2 * W) and out.dtype == jnp.float32
    ref = reference(x, conv_w, conv_b)
    np.testing.assert_allclose(np.asarray(out), np.asarray(ref),
                               atol=2e-4, rtol=2e-4)
    print("KERNEL_OK")
</pallas_src>

<mosaic_0001>
module attributes {stable_mosaic.version = 11 : i64} {
  func.func @kernel(%arg0: i32, %arg1: memref<1x16x128xf32, #tpu.memory_space<vmem>>, %arg2: memref<128x384xf32, #tpu.memory_space<vmem>>, %arg3: memref<3x32x16xf32, #tpu.memory_space<vmem>>, %arg4: memref<128x128xf32, #tpu.memory_space<vmem>>, %arg5: memref<1x32x128xf32, #tpu.memory_space<vmem>>) attributes {dimension_semantics = [#tpu.dimension_semantics<parallel>], iteration_bounds = array<i64: 2>, scalar_prefetch = 0 : i64, scratch_operands = 0 : i64, tpu.core_type = #tpu.core_type<tc>, window_params = [{transform_indices = @transform_0, window_bounds = array<i64: 1, 16, 128>}, {pipeline_mode = #tpu.pipeline_mode<synchronous>, transform_indices = @transform_1, window_bounds = array<i64: 128, 384>}, {pipeline_mode = #tpu.pipeline_mode<synchronous>, transform_indices = @transform_2, window_bounds = array<i64: 3, 32, 16>}, {pipeline_mode = #tpu.pipeline_mode<synchronous>, transform_indices = @transform_3, window_bounds = array<i64: 128, 128>}, {transform_indices = @transform_4, window_bounds = array<i64: 1, 32, 128>}]} {
    %c0 = arith.constant 0 : index
    %c0_0 = arith.constant 0 : index
    %0 = vector.load %arg2[%c0, %c0_0] : memref<128x384xf32, #tpu.memory_space<vmem>>, vector<128x384xf32>
    %c0_1 = arith.constant 0 : index
    %c0_2 = arith.constant 0 : index
    %1 = vector.load %arg4[%c0_1, %c0_2] : memref<128x128xf32, #tpu.memory_space<vmem>>, vector<128x128xf32>
    %c0_3 = arith.constant 0 : index
    %c0_4 = arith.constant 0 : index
    %c0_5 = arith.constant 0 : index
    %2 = vector.load %arg1[%c0_3, %c0_4, %c0_5] : memref<1x16x128xf32, #tpu.memory_space<vmem>>, vector<1x16x128xf32>
    %3 = vector.shape_cast %2 : vector<1x16x128xf32> to vector<16x128xf32>
    %cst = arith.constant dense<0.000000e+00> : vector<16x384xf32>
    %4 = tpu.matmul %3, %0, %cst {dimension_numbers = #tpu.dot_dimension_numbers<[1], [0], [0], [1], [0, 0, 1, 1], [], []>} : vector<16x128xf32>, vector<128x384xf32>, vector<16x384xf32> -> vector<16x384xf32>
    %c0_6 = arith.constant 0 : index
    %c0_7 = arith.constant 0 : index
    %c0_8 = arith.constant 0 : index
    %5 = vector.load %arg3[%c0_6, %c0_7, %c0_8] : memref<3x32x16xf32, #tpu.memory_space<vmem>>, vector<1x32x16xf32>
    %6 = vector.shape_cast %5 : vector<1x32x16xf32> to vector<32x16xf32>
    %7 = vector.extract_strided_slice %4 {offsets = [0, 0], sizes = [16, 128], strides = [1, 1]} : vector<16x384xf32> to vector<16x128xf32>
    %cst_9 = arith.constant dense<0.000000e+00> : vector<32x128xf32>
    %8 = tpu.matmul %6, %7, %cst_9 {dimension_numbers = #tpu.dot_dimension_numbers<[1], [0], [0], [1], [0, 0, 1, 1], [], []>} : vector<32x16xf32>, vector<16x128xf32>, vector<32x128xf32> -> vector<32x128xf32>
    %c1 = arith.constant 1 : index
    %c0_10 = arith.constant 0 : index
    %c0_11 = arith.constant 0 : index
    %9 = vector.load %arg3[%c1, %c0_10, %c0_11] : memref<3x32x16xf32, #tpu.memory_space<vmem>>, vector<1x32x16xf32>
    %10 = vector.shape_cast %9 : vector<1x32x16xf32> to vector<32x16xf32>
    %11 = vector.extract_strided_slice %4 {offsets = [0, 128], sizes = [16, 128], strides = [1, 1]} : vector<16x384xf32> to vector<16x128xf32>
    %cst_12 = arith.constant dense<0.000000e+00> : vector<32x128xf32>
    %12 = tpu.matmul %10, %11, %cst_12 {dimension_numbers = #tpu.dot_dimension_numbers<[1], [0], [0], [1], [0, 0, 1, 1], [], []>} : vector<32x16xf32>, vector<16x128xf32>, vector<32x128xf32> -> vector<32x128xf32>
    %13 = arith.addf %8, %12 : vector<32x128xf32>
    %c2 = arith.constant 2 : index
    %c0_13 = arith.constant 0 : index
    %c0_14 = arith.constant 0 : index
    %14 = vector.load %arg3[%c2, %c0_13, %c0_14] : memref<3x32x16xf32, #tpu.memory_space<vmem>>, vector<1x32x16xf32>
    %15 = vector.shape_cast %14 : vector<1x32x16xf32> to vector<32x16xf32>
    %16 = vector.extract_strided_slice %4 {offsets = [0, 256], sizes = [16, 128], strides = [1, 1]} : vector<16x384xf32> to vector<16x128xf32>
    %cst_15 = arith.constant dense<0.000000e+00> : vector<32x128xf32>
    %17 = tpu.matmul %15, %16, %cst_15 {dimension_numbers = #tpu.dot_dimension_numbers<[1], [0], [0], [1], [0, 0, 1, 1], [], []>} : vector<32x16xf32>, vector<16x128xf32>, vector<32x128xf32> -> vector<32x128xf32>
    %18 = arith.addf %13, %17 : vector<32x128xf32>
    %cst_16 = arith.constant dense<0.000000e+00> : vector<32x128xf32>
    %19 = tpu.matmul %18, %1, %cst_16 {dimension_numbers = #tpu.dot_dimension_numbers<[1], [0], [0], [1], [0, 0, 1, 1], [], []>} : vector<32x128xf32>, vector<128x128xf32>, vector<32x128xf32> -> vector<32x128xf32>
    %cst_17 = arith.constant dense<0.000000e+00> : vector<128xf32>
    %20 = vector.multi_reduction <add>, %19, %cst_17 [0] : vector<32x128xf32> to vector<128xf32>
    %21 = vector.shape_cast %20 : vector<128xf32> to vector<1x128xf32>
    %cst_18 = arith.constant 9.765625E-4 : f32
    %22 = vector.broadcast %cst_18 : f32 to vector<1x128xf32>
    %23 = arith.mulf %21, %22 : vector<1x128xf32>
    %24 = vector.broadcast %23 : vector<1x128xf32> to vector<32x128xf32>
    %25 = arith.subf %18, %24 : vector<32x128xf32>
    %26 = arith.mulf %25, %25 : vector<32x128xf32>
    %cst_19 = arith.constant dense<0.000000e+00> : vector<32x128xf32>
    %27 = tpu.matmul %26, %1, %cst_19 {dimension_numbers = #tpu.dot_dimension_numbers<[1], [0], [0], [1], [0, 0, 1, 1], [], []>} : vector<32x128xf32>, vector<128x128xf32>, vector<32x128xf32> -> vector<32x128xf32>
    %cst_20 = arith.constant dense<0.000000e+00> : vector<128xf32>
    %28 = vector.multi_reduction <add>, %27, %cst_20 [0] : vector<32x128xf32> to vector<128xf32>
    %29 = vector.shape_cast %28 : vector<128xf32> to vector<1x128xf32>
    %cst_21 = arith.constant 9.765625E-4 : f32
    %30 = vector.broadcast %cst_21 : f32 to vector<1x128xf32>
    %31 = arith.mulf %29, %30 : vector<1x128xf32>
    %cst_22 = arith.constant 9.99999974E-6 : f32
    %32 = vector.broadcast %cst_22 : f32 to vector<1x128xf32>
    %33 = arith.addf %31, %32 : vector<1x128xf32>
    %34 = math.rsqrt %33 : vector<1x128xf32>
    %35 = vector.broadcast %34 : vector<1x128xf32> to vector<32x128xf32>
    %36 = arith.mulf %25, %35 : vector<32x128xf32>
    %cst_23 = arith.constant 0.000000e+00 : f32
    %37 = vector.broadcast %cst_23 : f32 to vector<32x128xf32>
    %38 = arith.maximumf %36, %37 : vector<32x128xf32>
    %c0_24 = arith.constant 0 : index
    %c0_25 = arith.constant 0 : index
    %c0_26 = arith.constant 0 : index
    %39 = vector.load %arg5[%c0_24, %c0_25, %c0_26] : memref<1x32x128xf32, #tpu.memory_space<vmem>>, vector<1x32x128xf32>
    %40 = vector.shape_cast %39 : vector<1x32x128xf32> to vector<32x128xf32>
    %41 = vector.shape_cast %38 : vector<32x128xf32> to vector<1x32x128xf32>
    tpu.vector_store %arg5[%c0_24, %c0_25, %c0_26], %41 {strides = array<i32>} : memref<1x32x128xf32, #tpu.memory_space<vmem>>, vector<1x32x128xf32>,
    return
  }
  func.func @transform_0(%arg0: i32) -> (i32, i32, i32) {
    %c0_i32 = arith.constant 0 : i32
    %c0_i32_0 = arith.constant 0 : i32
    %c0_i32_1 = arith.constant 0 : i32
    return %arg0, %c0_i32, %c0_i32_0 : i32, i32, i32
  }
  func.func @transform_1(%arg0: i32) -> (i32, i32) {
    %c0_i32 = arith.constant 0 : i32
    %c0_i32_0 = arith.constant 0 : i32
    %c0_i32_1 = arith.constant 0 : i32
    return %c0_i32, %c0_i32_0 : i32, i32
  }
  func.func @transform_2(%arg0: i32) -> (i32, i32, i32) {
    %c0_i32 = arith.constant 0 : i32
    %c0_i32_0 = arith.constant 0 : i32
    %c0_i32_1 = arith.constant 0 : i32
    %c0_i32_2 = arith.constant 0 : i32
    return %c0_i32, %c0_i32_0, %c0_i32_1 : i32, i32, i32
  }
  func.func @transform_3(%arg0: i32) -> (i32, i32) {
    %c0_i32 = arith.constant 0 : i32
    %c0_i32_0 = arith.constant 0 : i32
    %c0_i32_1 = arith.constant 0 : i32
    return %c0_i32, %c0_i32_0 : i32, i32
  }
  func.func @transform_4(%arg0: i32) -> (i32, i32, i32) {
    %c0_i32 = arith.constant 0 : i32
    %c0_i32_0 = arith.constant 0 : i32
    %c0_i32_1 = arith.constant 0 : i32
    return %arg0, %c0_i32, %c0_i32_0 : i32, i32, i32
  }
}

</mosaic_0001>

<bundles_post_ra>
// kernel: tpu_custom_call.1
= control target key start
LH: loop header
LB: loop body
LE: loop exit
PB: predicated region body
PF: predicated region fallthrough
CT: control target
= control target key end

     0   :  { %9 = vsyncpa [#allocation3], 0  ;;  %s1828_s0 = inlined_call_operand.hbm [shape: f32[2,16,128], index: 0, kind: input, shape index: {}]   ;;  %s1829_s1 = inlined_call_operand.hbm [shape: f32[128,384], index: 1, kind: input, shape index: {}]   ;;  %s1830_s2 = inlined_call_operand.vmem [shape: f32[3,32,16], index: 2, kind: input, shape index: {}]   ;;  %s1831_s3 = inlined_call_operand.vmem [shape: f32[128,128], index: 3, kind: input, shape index: {}]   ;;  %s1832_s4 = inlined_call_operand.hbm [shape: f32[2,32,128], index: 4, kind: output, shape index: {}]  }
   0x1   :  { %11 = vsyncpa [#allocation3 + $0x1], 0 }
   0x2   :  { %12 = vsyncpa [#allocation6], 0 }
   0x3   :  { %13 = vsyncpa [#allocation4], 0 }
   0x4   :  { %15 = vsyncpa [#allocation4 + $0x1], 0  ;;  %s1548_s15 = smov 0   ;;  %s1550_s16 = smov 0  }
   0x5   :  { %s1552_s17 = smov 0   ;;  %s1554_s18 = smov 0  }
   0x6 LB: > { %s1569_s19 = sadd.s32 4294967295, %s1511_s18   ;;  %s1068_s20 = sadd.s32 4294967294, %s1511_s18   ;;  %s1511_s18 = sphi %s1554_s18, %s1854_s18   ;;  %s1507_s17 = sphi %s1552_s17, %s1853_s17   ;;  %s1503_s16 = sphi %s1550_s16, %s1852_s16   ;;  %s1499_s15 = sphi %s1548_s15, %s1851_s15  }
   0x7   : > { %p41_p0 = scmp.ne.s32.totalorder %s1503_s16, %s1499_s15  ;;  %p1833_p1 = scmp.eq.s32.totalorder %s1569_s19, 0 }
   0x8   : > { %p134_p3 = scmp.eq.s32.totalorder %s1068_s20, 1  ;;  %p1069_p5 = scmp.ge.s32.totalorder %s1511_s18, 1 }
   0x9   : > { %p1578_p4 = por %p1833_p1, %p41_p0  ;;  %p141_p7 = scmp.lt.s32.totalorder %s1511_s18, 3 }
   0xa   : > { %p1583_p6 = por %p134_p3, %p41_p0  ;;  %s1513_s24 = smov [#allocation5]  }
   0xb   : > { %s1837_s21 = scalar_select %p1578_p4, 1, 0 }
   0xc   : > { %s1838_s22 = scalar_select %p1583_p6, 1, 0 }
   0xd   : > { %p1588_p8 = pnand %p1069_p5, %p141_p7  ;;  %s153_s25 = sshll.u32 %s1513_s24, 4  ;;  %s154_s25 = int_to_ptr.vmem [resolvable:$true] %s153_s25 }
   0xe   : > { %s1602_s27 = sadd.s32 1, %s1511_s18   ;;  %s28_s28 = sadd.s32 1, %s1507_s17 }
   0xf   : > { %s1839_s23 = scalar_select %p1588_p8, 1, 0 }
  0x10   : > { %p1331_p9 = pneg %p1588_p8  ;;  %s25_s29 = ssub.s32 %s1511_s18, %s1602_s27 }
  0x11   : > { %s1400_s30 = scalar_lea.vmem %s154_s25, 6144  ;;  %p1408_p5 = scmp.lt.s32.totalorder %s154_s25, %s154_s25 }
  0x12   : > { %p1597_p11 = pnand %p1331_p9, %p1833_p1  ;;  %p1401_p13 = scmp.ne.s32.totalorder %s154_s25, %s1400_s30 }
  0x13   : > { %p1409_p7 = scmp.lt.s32.totalorder %s1400_s30, %s1400_s30 }
  0x14   : > { %p1391_p12 = pneg %p1597_p11 }
  0x15   : > { %p1410_p10 = por %p1409_p7, %p1408_p5 }
  0x16   : > { %p1403_p0 = pnand %p1401_p13, %p1391_p12 }
  0x18   : > { %p1404_p3 = pneg %p1403_p0 }
  0x1a   : > { %p1411_p2 = pnand %p1410_p10, %p1404_p3 }
  0x1c   : > { %1414 = shalt.err (!%p1411_p2)
}
  0x1d   : > { %s1514_s5 = smov 384   ;;  %s1515_s6 = smov 24  }
  0x1e   : > { %1334 = dma.hbm_to_vmem [thread:$0]  (!%p1597_p11), %s1829_s1, 6144, %s154_s25, [#allocation6], %s1514_s5, %s1514_s5, %s1515_s6  }
  0x1f   : > { %p26_p9 = scmp.eq.s32.totalorder %s25_s29, 0  ;;  %p35_p12 = scmp.ne.s32.totalorder %s1507_s17, %s1503_s16 }
  0x20   : > { %p36_p10 = scmp.eq.s32.totalorder %s1511_s18, 0  ;;  %p1344_p2 = scmp.lt.s32.totalorder %s1511_s18, 2 }
  0x21   : > { %s1619_s9 = scalar_select %p26_p9, %s1507_s17, %s28_s28  }
  0x22   : > { %p37_p13 = por %p36_p10, %p35_p12  ;;  %p1841_p0 = scmp.eq.s32.totalorder %s1569_s19, 1 }
  0x23   : > { %s173_s11 = sand.u32 1, %s1507_s17   ;;  %s1104_s12 = sshll.u32 %s1511_s18, 8 }
  0x24   : > { %p1623_p3 = por %p1841_p0, %p35_p12  ;;  %s1072_s13 = sshll.u32 %s173_s11, 4 }
  0x25   : > { %s1632_s24 = scalar_lea.hbm %s1828_s0, %s1104_s12  ;;  %s177_s25 = scalar_lea.vmem [#allocation2], %s1072_s13 }
  0x26   : > { %s1842_s10 = scalar_select %p1623_p3, 1, 0 }
  0x27   : > { %s184_s26 = sshll.u32 %s177_s25, 4  ;;  %p1634_p11 = pnand %p1344_p2, %p37_p13  ;;  %s1638_s26 = int_to_ptr.vmem [resolvable:$true] %s184_s26 }
  0x28   : > { %s1640_s29 = scalar_lea.sflag [#allocation3], %s173_s11  ;;  %s1415_s30 = scalar_lea.hbm %s1632_s24, 256 }
  0x29   : > { %p1416_p5 = scmp.ne.s32.totalorder %s1632_s24, %s1415_s30  ;;  %p1417_p7 = pneg %p1634_p11 }
  0x2a   : > { %s1420_s7 = scalar_lea.hbm %s1828_s0, 512  ;;  %p1421_p10 = scmp.lt.s32.totalorder %s1632_s24, %s1828_s0 }
  0x2b   : > { %p1418_p9 = pnand %p1417_p7, %p1416_p5  ;;  %p1422_p2 = scmp.lt.s32.totalorder %s1420_s7, %s1415_s30 }
  0x2d   : > { %p1419_p12 = pneg %p1418_p9  ;;  %p1423_p13 = por %p1422_p2, %p1421_p10 }
  0x2f   : > { %p1424_p0 = pnand %p1423_p13, %p1419_p12 }
  0x31   : > { %1427 = shalt.err (!%p1424_p0)
}
  0x32   : > { %s1428_s11 = scalar_lea.vmem %s1638_s26, 256  ;;  %s1516_s13 = smov [#allocation2]  }
  0x33   : > { %p1429_p1 = scmp.ne.s32.totalorder %s1638_s26, %s1428_s11  ;;  %s1433_s14 = sshll.u32 %s1516_s13, 4  ;;  %s1434_s14 = int_to_ptr.vmem [resolvable:$false] %s1433_s14 }
  0x34   : > { %s1435_s20 = scalar_lea.vmem %s1434_s14, 512  ;;  %p1436_p9 = scmp.lt.s32.totalorder %s1638_s26, %s1434_s14 }
  0x35   : > { %p1431_p6 = pnand %p1429_p1, %p1417_p7  ;;  %p1437_p3 = scmp.lt.s32.totalorder %s1435_s20, %s1428_s11 }
  0x37   : > { %p1432_p5 = pneg %p1431_p6  ;;  %p1438_p4 = por %p1437_p3, %p1436_p9 }
  0x39   : > { %p1439_p8 = pnand %p1438_p4, %p1432_p5 }
  0x3b   : > { %1442 = shalt.err (!%p1439_p8)
}
  0x3c   : > { %s1517_s25 = smov 128   ;;  %s1518_s30 = smov 8  }
  0x3d   : > { %1338 = dma.hbm_to_vmem [thread:$0]  (!%p1634_p11), %s1632_s24, 256, %s1638_s26, %s1640_s29, %s1517_s25, %s1517_s25, %s1518_s30  }
  0x3e   : > { %p1844_p1 = scmp.ne.s32.totalorder %s1839_s23, 0 }
  0x3f   : > { %s1664_s5 = sand.u32 (!%p1844_p1), 1, %s1503_s16   ;;  %p1845_p4 = scmp.ne.s32.totalorder (!%p1844_p1), %s1837_s21, 0 }
  0x40   : > { %196 = sbr.rel (%p1844_p1) target bundleno = 989 (0x3dd), region = 36  ;;  %s1076_s6 = sshll.u32 (!%p1844_p1), %s1664_s5, 4 }
  0x41   : > { %s199_s7 = scalar_lea.sflag (!%p1844_p1), [#allocation3], %s1664_s5  ;;  %s1668_s8 = scalar_lea.vmem (!%p1844_p1), [#allocation2], %s1076_s6 }
  0x45   : > { %1486 = dma.done.wait (%p1845_p4), %s199_s7, 256  }
  0x46   : > { %1488 = vsyncadd (%p1845_p4), %s199_s7, 4294967040  ;;  %p1846_p6 = scmp.eq.s32.totalorder %s1569_s19, 0 }
  0x48   : > { %1490 = dma.done.wait (%p1846_p6), [#allocation6], 6144   ;;  %p1847_p8 = pmov %p1846_p6 }
  0x49   : > { %v1519_v0 = vmov 0.0   ;;  %v277_v1 = vld [vmem:[#allocation5 + $0x170] sm:$0xff]  ;;  %v276_v2 = vld [vmem:[#allocation5 + $0x168] sm:$0xff]  ;;  %v274_v3 = vld [vmem:[#allocation5 + $0x158] sm:$0xff]  ;;  %vm458_vm0 = vcmask 130048   ;;  %s1078_s13 = sshll.u32 %s1664_s5, 5 }
  0x4a   : > { %1492 = vsyncadd (%p1847_p8), [#allocation6], 4294961152  ;;  %361 = vmatprep.mubr.f32.mxu0 %v1519_v0  ;;  %297 = vmatprep.subr.mxu0 %v277_v1  ;;  %v273_v4 = vld [vmem:[#allocation5 + $0x150] sm:$0xff]  ;;  %v271_v5 = vld [vmem:[#allocation5 + $0x140] sm:$0xff]  ;;  %s1105_s14 = sshll.u32 %s1569_s19, 9  ;;  %s230_s20 = scalar_lea.vmem [#allocation7], %s1078_s13 }
  0x4b   : > { %298 = vmatpush1.msra.mxu0 %v276_v2  ;;  %v270_v6 = vld [vmem:[#allocation5 + $0x138] sm:$0xff]  ;;  %v268_v8 = vld [vmem:[#allocation5 + $0x128] sm:$0xff]  ;;  %v275_v9 = vld [vmem:[#allocation5 + $0x160] sm:$0xff]  ;;  %s985_s25 = sshll.u32 %s230_s20, 4  ;;  %s1783_s7 = scalar_lea.hbm %s1832_s4, %s1105_s14  ;;  %s1785_s25 = int_to_ptr.vmem [resolvable:$true] %s985_s25 }
  0x4c   : > { %299 = vmatprep.subr.mxu0 %v274_v3  ;;  %v278_v7 = vld [vmem:[#allocation5 + $0x178] sm:$0xff]  ;;  %v267_v10 = vld [vmem:[#allocation5 + $0x120] sm:$0xff]  ;;  %v272_v11 = vld [vmem:[#allocation5 + $0x148] sm:$0xff]  ;;  %s972_s19 = scalar_lea.sflag [#allocation4], %s1664_s5  ;;  %p1848_p11 = scmp.ne.s32.totalorder %s1842_s10, 0 }
  0x4d   : > { %300 = vmatpush1.msra.mxu0 %v273_v4  ;;  %1182 = vmatprep.subr.mxu1 %v278_v7  ;;  %v265_v12 = vld [vmem:[#allocation5 + $0x110] sm:$0xff]  ;;  %v264_v13 = vld [vmem:[#allocation5 + $0x108] sm:$0xff]  ;;  %v262_v15 = vld [vmem:[#allocation5 + $0xf8] sm:$0xff]  ;;  %s1520_s21 = smov [#allocation7]  }
  0x4e   : > { %301 = vmatprep.subr.mxu0 %v271_v5  ;;  %1183 = vmatpush3.msra.mxu1 %v278_v7  ;;  %v269_v14 = vld [vmem:[#allocation5 + $0x130] sm:$0xff]  ;;  %v266_v17 = vld [vmem:[#allocation5 + $0x118] sm:$0xff]  ;;  %v259_v18 = vld [vmem:[#allocation5 + $0xe0] sm:$0xff]  ;;  %s1447_s23 = sshll.u32 %s1520_s21, 4  ;;  %s1448_s23 = int_to_ptr.vmem [resolvable:$false] %s1447_s23 }
  0x4f   : > { %302 = vmatpush1.msra.mxu0 %v270_v6  ;;  %1184 = vmatprep.subr.mxu1 %v275_v9  ;;  %v261_v16 = vld [vmem:[#allocation5 + $0xf0] sm:$0xff]  ;;  %v258_v19 = vld [vmem:[#allocation5 + $0xd8] sm:$0xff]  ;;  %v263_v20 = vld [vmem:[#allocation5 + $0x100] sm:$0xff]  ;;  %s1449_s24 = scalar_lea.vmem %s1448_s23, 1024  ;;  %p1450_p10 = scmp.lt.s32.totalorder %s1785_s25, %s1448_s23 }
  0x50   : > { %303 = vmatprep.subr.mxu0 %v268_v8  ;;  %1185 = vmatpush3.msra.mxu1 %v275_v9  ;;  %v256_v21 = vld [vmem:[#allocation5 + $0xc8] sm:$0xff]  ;;  %v255_v22 = vld [vmem:[#allocation5 + $0xc0] sm:$0xff]  ;;  %v253_v24 = vld [vmem:[#allocation5 + $0xb0] sm:$0xff] }
  0x51   : > { %304 = vmatpush1.msra.mxu0 %v267_v10  ;;  %1186 = vmatprep.subr.mxu1 %v272_v11  ;;  %v260_v23 = vld [vmem:[#allocation5 + $0xe8] sm:$0xff]  ;;  %v257_v26 = vld [vmem:[#allocation5 + $0xd0] sm:$0xff]  ;;  %v250_v27 = vld [vmem:[#allocation5 + $0x98] sm:$0xff] }
  0x52   : > { %305 = vmatprep.subr.mxu0 %v265_v12  ;;  %1187 = vmatpush3.msra.mxu1 %v272_v11  ;;  %v252_v25 = vld [vmem:[#allocation5 + $0xa8] sm:$0xff]  ;;  %v249_v28 = vld [vmem:[#allocation5 + $0x90] sm:$0xff]  ;;  %v254_v29 = vld [vmem:[#allocation5 + $0xb8] sm:$0xff] }
  0x53   : > { %306 = vmatpush1.msra.mxu0 %v264_v13  ;;  %1188 = vmatprep.subr.mxu1 %v269_v14  ;;  %v247_v30 = vld [vmem:[#allocation5 + $0x80] sm:$0xff]  ;;  %v246_v31 = vld [vmem:[#allocation5 + $0x78] sm:$0xff]  ;;  %v244_v33 = vld [vmem:[#allocation5 + $0x68] sm:$0xff] }
  0x54   : > { %307 = vmatprep.subr.mxu0 %v262_v15  ;;  %1189 = vmatpush3.msra.mxu1 %v269_v14  ;;  %v251_v32 = vld [vmem:[#allocation5 + $0xa0] sm:$0xff]  ;;  %v248_v35 = vld [vmem:[#allocation5 + $0x88] sm:$0xff]  ;;  %v241_v36 = vld [vmem:[#allocation5 + $0x50] sm:$0xff] }
  0x55   : > { %308 = vmatpush1.msra.mxu0 %v261_v16  ;;  %1190 = vmatprep.subr.mxu1 %v266_v17  ;;  %v243_v34 = vld [vmem:[#allocation5 + $0x60] sm:$0xff]  ;;  %v240_v37 = vld [vmem:[#allocation5 + $0x48] sm:$0xff]  ;;  %v245_v38 = vld [vmem:[#allocation5 + $0x70] sm:$0xff] }
  0x56   : > { %309 = vmatprep.subr.mxu0 %v259_v18  ;;  %1191 = vmatpush3.msra.mxu1 %v266_v17  ;;  %v238_v39 = vld [vmem:[#allocation5 + $0x38] sm:$0xff]  ;;  %v237_v40 = vld [vmem:[#allocation5 + $0x30] sm:$0xff]  ;;  %v235_v42 = vld [vmem:[#allocation5 + $0x20] sm:$0xff] }
  0x57   : > { %310 = vmatpush1.msra.mxu0 %v258_v19  ;;  %1192 = vmatprep.subr.mxu1 %v263_v20  ;;  %v242_v41 = vld [vmem:[#allocation5 + $0x58] sm:$0xff]  ;;  %v239_v44 = vld [vmem:[#allocation5 + $0x40] sm:$0xff]  ;;  %v232_v45 = vld [vmem:[#allocation5 + $0x8] sm:$0xff] }
  0x58   : > { %311 = vmatprep.subr.mxu0 %v256_v21  ;;  %1193 = vmatpush3.msra.mxu1 %v263_v20  ;;  %v234_v43 = vld [vmem:[#allocation5 + $0x18] sm:$0xff]  ;;  %v231_v46 = vld [vmem:[#allocation5] sm:$0xff]  ;;  %v236_v47 = vld [vmem:[#allocation5 + $0x28] sm:$0xff] }
  0x59   : > { %312 = vmatpush1.msra.mxu0 %v255_v22  ;;  %1194 = vmatprep.subr.mxu1 %v260_v23  ;;  %v295_v48 = vld [vmem:[%s1668_s8] sm:$0xff]  ;;  %v296_v50 = vld [vmem:[%s1668_s8 + $0x8] sm:$0xff]  ;;  %s1443_s8 = scalar_lea.vmem %s1785_s25, 512 }
  0x5a   : > { %313 = vmatprep.subr.mxu0 %v253_v24  ;;  %1195 = vmatpush3.msra.mxu1 %v260_v23  ;;  %v233_v49 = vld [vmem:[#allocation5 + $0x10] sm:$0xff]  ;;  %v1079_v51 = vld [vmem:[%s1830_s2 + $0x20] sm:$0xff]  ;;  %v450_v58 = vld [vmem:[%s1830_s2 + $0x8] sm:$0xff]  ;;  %p1444_p3 = scmp.ne.s32.totalorder %s1785_s25, %s1443_s8  ;;  %p1451_p2 = scmp.lt.s32.totalorder %s1449_s24, %s1443_s8 }
  0x5b   : > { %314 = vmatpush1.msra.mxu0 %v252_v25  ;;  %1196 = vmatprep.subr.mxu1 %v257_v26  ;;  %v449_v52 = vld [vmem:[%s1830_s2] sm:$0xff]  ;;  %v451_v59 = vld [vmem:[%s1830_s2 + $0x10] sm:$0xff]  ;;  %v1080_v60 = vld [vmem:[%s1830_s2 + $0x28] sm:$0xff] }
  0x5c   : > { %315 = vmatprep.subr.mxu0 %v250_v27  ;;  %1197 = vmatpush3.msra.mxu1 %v257_v26  ;;  %v1081_v61 = vld [vmem:[%s1830_s2 + $0x30] sm:$0xff]  ;;  %v452_v63 = vld [vmem:[%s1830_s2 + $0x18] sm:$0xff]  ;;  %v1091_v2 = vld [vmem:[%s1830_s2 + $0x40] sm:$0xff]  ;;  %p1445_p7 = pnand %p1444_p3, %p1848_p11  ;;  %p1452_p13 = por %p1451_p2, %p1450_p10 }
  0x5d   : > { %316 = vmatpush1.msra.mxu0 %v249_v28  ;;  %1198 = vmatprep.subr.mxu1 %v254_v29  ;;  %v1082_v1 = vld [vmem:[%s1830_s2 + $0x38] sm:$0xff]  ;;  %v293_v3 = vld [vmem:[%s1831_s3 + $0x70] sm:$0xff]  ;;  %v292_v4 = vld [vmem:[%s1831_s3 + $0x68] sm:$0xff] }
  0x5e   : > { %317 = vmatprep.subr.mxu0 %v247_v30  ;;  %1199 = vmatpush3.msra.mxu1 %v254_v29  ;;  %v1092_v5 = vld [vmem:[%s1830_s2 + $0x48] sm:$0xff]  ;;  %v1093_v6 = vld [vmem:[%s1830_s2 + $0x50] sm:$0xff]  ;;  %v291_v7 = vld [vmem:[%s1831_s3 + $0x60] sm:$0xff]  ;;  %p1446_p12 = pneg %p1445_p7 }
  0x5f   : > { %318 = vmatpush1.msra.mxu0 %v246_v31  ;;  %1200 = vmatprep.subr.mxu1 %v251_v32  ;;  %v290_v8 = vld [vmem:[%s1831_s3 + $0x58] sm:$0xff]  ;;  %v289_v10 = vld [vmem:[%s1831_s3 + $0x50] sm:$0xff]  ;;  %v288_v11 = vld [vmem:[%s1831_s3 + $0x48] sm:$0xff] }
  0x60   : > { %319 = vmatprep.subr.mxu0 %v244_v33  ;;  %1201 = vmatpush3.msra.mxu1 %v251_v32  ;;  %v1094_v9 = vld [vmem:[%s1830_s2 + $0x58] sm:$0xff]  ;;  %v287_v12 = vld [vmem:[%s1831_s3 + $0x40] sm:$0xff]  ;;  %v285_v14 = vld [vmem:[%s1831_s3 + $0x30] sm:$0xff]  ;;  %p1453_p0 = pnand %p1452_p13, %p1446_p12 }
  0x61   : > { %320 = vmatpush1.msra.mxu0 %v243_v34  ;;  %1202 = vmatprep.subr.mxu1 %v248_v35  ;;  %v286_v13 = vld [vmem:[%s1831_s3 + $0x38] sm:$0xff]  ;;  %v284_v15 = vld [vmem:[%s1831_s3 + $0x28] sm:$0xff]  ;;  %v283_v16 = vld [vmem:[%s1831_s3 + $0x20] sm:$0xff] }
  0x62   : > { %321 = vmatprep.subr.mxu0 %v241_v36  ;;  %1203 = vmatpush3.msra.mxu1 %v248_v35  ;;  %v282_v17 = vld [vmem:[%s1831_s3 + $0x18] sm:$0xff]  ;;  %v281_v18 = vld [vmem:[%s1831_s3 + $0x10] sm:$0xff]  ;;  %v280_v19 = vld [vmem:[%s1831_s3 + $0x8] sm:$0xff] }
  0x63   : > { %322 = vmatpush1.msra.mxu0 %v240_v37  ;;  %1204 = vmatprep.subr.mxu1 %v245_v38  ;;  %v279_v20 = vld [vmem:[%s1831_s3] sm:$0xff] }
  0x64   : > { %323 = vmatprep.subr.mxu0 %v238_v39  ;;  %1205 = vmatpush3.msra.mxu1 %v245_v38 }
  0x65   : > { %324 = vmatpush1.msra.mxu0 %v237_v40  ;;  %1206 = vmatprep.subr.mxu1 %v242_v41 }
  0x66   : > { %325 = vmatprep.subr.mxu0 %v235_v42  ;;  %1207 = vmatpush3.msra.mxu1 %v242_v41 }
  0x67   : > { %326 = vmatpush1.msra.mxu0 %v234_v43  ;;  %1208 = vmatprep.subr.mxu1 %v239_v44 }
  0x68   : > { %327 = vmatprep.subr.mxu0 %v232_v45  ;;  %1209 = vmatpush3.msra.mxu1 %v239_v44 }
  0x69   : > { %328 = vmatpush1.msra.mxu0 %v231_v46  ;;  %1210 = vmatprep.subr.mxu1 %v236_v47 }
  0x6a   : > { %362 = vmatmul.mubr.f32.vlgmr.msra.gmra.mxu0 %v295_v48  ;;  %1211 = vmatpush3.msra.mxu1 %v236_v47 }
  0x6b   : > { %367 = vmatprep.mubr.f32.mxu0 %v1519_v0  ;;  %1212 = vmatprep.subr.mxu1 %v233_v49  ;;  %v294_v0 = vld [vmem:[%s1831_s3 + $0x78] sm:$0xff] }
  0x6c   : > { %1213 = vmatpush3.msra.mxu1 %v233_v49  ;;  %1214 = vmatprep.mubr.f32.mxu1 %v295_v48 }
  0x6d   : > { %1215 = vmatmul.mubr.f32.vlgmr.msra.gmra.mxu1 %v296_v50 }
  0x6e   : > { %368 = vmatmul.mubr.f32.gmra.mxu0 %v296_v50  ;;  %1221 = vmatprep.mubr.msk.f32.mxu1 %vm458_vm0, %v1079_v51 }
  0x6f   : > { %1231 = vmatprep.mubr.msk.f32.mxu0 %vm458_vm0, %v449_v52 }
 0x12a   : > { %v363_v53 = vpop.f32.mrf.mxu0 }
 0x12c   : > { %v365_v54 = vpop.f32.mrf.mxu0 }
 0x12d   : > { %v1216_v57 = vpop.f32.mrf.mxu1 }
 0x12e   : > { %v369_v55 = vpop.f32.mrf.mxu0 }
 0x12f   : > { %1227 = vmatprep.subr.mxu0 %v369_v55  ;;  %v440_v62 = vpop.f32.mrf.mxu1 }
 0x130   : > { %v371_v56 = vpop.f32.mrf.mxu0  ;;  %1228 = vmatpush3.msra.mxu0 %v369_v55 }
 0x131   : > { %1217 = vmatprep.subr.mxu1 %v371_v56  ;;  %1229 = vmatprep.subr.mxu0 %v363_v53 }
 0x132   : > { %1218 = vmatpush3.msra.mxu1 %v371_v56  ;;  %1230 = vmatpush3.msra.mxu0 %v363_v53 }
 0x133   : > { %1219 = vmatprep.subr.mxu1 %v365_v54  ;;  %1232 = vmatmul.mubr.msk.f32.vlgmr.msra.gmra.mxu0 %vm458_vm0, %v450_v58 }
 0x134   : > { %1220 = vmatpush3.msra.mxu1 %v365_v54  ;;  %1234 = vmatprep.mubr.msk.f32.mxu0 %vm458_vm0, %v451_v59 }
 0x135   : > { %1222 = vmatmul.mubr.msk.f32.vlgmr.msra.gmra.mxu1 %vm458_vm0, %v1080_v60  ;;  %1237 = vmatprep.subr.mxu1 %v1216_v57 }
 0x136   : > { %1238 = vmatpush3.msra.mxu1 %v1216_v57  ;;  %1224 = vmatprep.mubr.msk.f32.mxu1 %vm458_vm0, %v1081_v61 }
 0x137   : > { %1239 = vmatprep.subr.mxu1 %v440_v62  ;;  %1235 = vmatmul.mubr.msk.f32.gmra.mxu0 %vm458_vm0, %v452_v63 }
 0x138   : > { %1240 = vmatpush3.msra.mxu1 %v440_v62  ;;  %1247 = vmatprep.subr.mxu0 %v294_v0 }
 0x139   : > { %1225 = vmatmul.mubr.msk.f32.gmra.mxu1 %vm458_vm0, %v1082_v1  ;;  %1248 = vmatpush3.msra.mxu0 %v294_v0 }
 0x13a   : > { %1241 = vmatprep.mubr.msk.f32.mxu1 %vm458_vm0, %v1091_v2  ;;  %1249 = vmatprep.subr.mxu0 %v293_v3 }
 0x13b   : > { %1250 = vmatpush3.msra.mxu0 %v293_v3  ;;  %1285 = vmatprep.subr.mxu1 %v294_v0 }
 0x13c   : > { %1251 = vmatprep.subr.mxu0 %v292_v4 }
 0x13d   : > { %1242 = vmatmul.mubr.msk.f32.vlgmr.msra.gmra.mxu1 %vm458_vm0, %v1092_v5  ;;  %1252 = vmatpush3.msra.mxu0 %v292_v4 }
 0x13e   : > { %1244 = vmatprep.mubr.msk.f32.mxu1 %vm458_vm0, %v1093_v6  ;;  %1253 = vmatprep.subr.mxu0 %v291_v7 }
 0x13f   : > { %1254 = vmatpush3.msra.mxu0 %v291_v7  ;;  %1286 = vmatpush3.msra.mxu1 %v294_v0 }
 0x140   : > { %1255 = vmatprep.subr.mxu0 %v290_v8  ;;  %1287 = vmatprep.subr.mxu1 %v293_v3 }
 0x141   : > { %1245 = vmatmul.mubr.msk.f32.gmra.mxu1 %vm458_vm0, %v1094_v9  ;;  %1256 = vmatpush3.msra.mxu0 %v290_v8 }
 0x142   : > { %1257 = vmatprep.subr.mxu0 %v289_v10  ;;  %1288 = vmatpush3.msra.mxu1 %v293_v3 }
 0x143   : > { %1258 = vmatpush3.msra.mxu0 %v289_v10  ;;  %1289 = vmatprep.subr.mxu1 %v292_v4 }
 0x144   : > { %1259 = vmatprep.subr.mxu0 %v288_v11  ;;  %1290 = vmatpush3.msra.mxu1 %v292_v4 }
 0x145   : > { %1260 = vmatpush3.msra.mxu0 %v288_v11  ;;  %1291 = vmatprep.subr.mxu1 %v291_v7 }
 0x146   : > { %1261 = vmatprep.subr.mxu0 %v287_v12  ;;  %1292 = vmatpush3.msra.mxu1 %v291_v7 }
 0x147   : > { %1262 = vmatpush3.msra.mxu0 %v287_v12  ;;  %1293 = vmatprep.subr.mxu1 %v290_v8 }
 0x148   : > { %1263 = vmatprep.subr.mxu0 %v286_v13  ;;  %1294 = vmatpush3.msra.mxu1 %v290_v8 }
 0x149   : > { %1264 = vmatpush3.msra.mxu0 %v286_v13  ;;  %1295 = vmatprep.subr.mxu1 %v289_v10 }
 0x14a   : > { %1296 = vmatpush3.msra.mxu1 %v289_v10  ;;  %1265 = vmatprep.subr.mxu0 %v285_v14 }
 0x14b   : > { %1297 = vmatprep.subr.mxu1 %v288_v11  ;;  %1266 = vmatpush3.msra.mxu0 %v285_v14 }
 0x14c   : > { %1298 = vmatpush3.msra.mxu1 %v288_v11  ;;  %1267 = vmatprep.subr.mxu0 %v284_v15 }
 0x14d   : > { %1299 = vmatprep.subr.mxu1 %v287_v12  ;;  %1268 = vmatpush3.msra.mxu0 %v284_v15 }
 0x14e   : > { %1300 = vmatpush3.msra.mxu1 %v287_v12  ;;  %1269 = vmatprep.subr.mxu0 %v283_v16 }
 0x14f   : > { %1301 = vmatprep.subr.mxu1 %v286_v13  ;;  %1270 = vmatpush3.msra.mxu0 %v283_v16 }
 0x150   : > { %1302 = vmatpush3.msra.mxu1 %v286_v13  ;;  %1271 = vmatprep.subr.mxu0 %v282_v17 }
 0x151   : > { %1303 = vmatprep.subr.mxu1 %v285_v14  ;;  %1272 = vmatpush3.msra.mxu0 %v282_v17 }
 0x152   : > { %1304 = vmatpush3.msra.mxu1 %v285_v14  ;;  %1273 = vmatprep.subr.mxu0 %v281_v18 }
 0x153   : > { %1305 = vmatprep.subr.mxu1 %v284_v15  ;;  %1274 = vmatpush3.msra.mxu0 %v281_v18 }
 0x154   : > { %1306 = vmatpush3.msra.mxu1 %v284_v15  ;;  %1275 = vmatprep.subr.mxu0 %v280_v19 }
 0x155   : > { %1307 = vmatprep.subr.mxu1 %v283_v16  ;;  %1276 = vmatpush3.msra.mxu0 %v280_v19 }
 0x156   : > { %1308 = vmatpush3.msra.mxu1 %v283_v16  ;;  %1277 = vmatprep.subr.mxu0 %v279_v20 }
 0x157   : > { %1309 = vmatprep.subr.mxu1 %v282_v17  ;;  %1278 = vmatpush3.msra.mxu0 %v279_v20 }
 0x158   : > { %1310 = vmatpush3.msra.mxu1 %v282_v17 }
 0x159   : > { %1311 = vmatprep.subr.mxu1 %v281_v18 }
 0x15a   : > { %1312 = vmatpush3.msra.mxu1 %v281_v18 }
 0x15b   : > { %1313 = vmatprep.subr.mxu1 %v280_v19 }
 0x15c   : > { %1314 = vmatpush3.msra.mxu1 %v280_v19 }
 0x15d   : > { %1315 = vmatprep.subr.mxu1 %v279_v20 }
 0x15e   : > { %1316 = vmatpush3.msra.mxu1 %v279_v20 }
 0x1f3   : > { %v1233_v21 = vpop.f32.mrf.mxu0 }
 0x1f5   : > { %v1223_v22 = vpop.f32.mrf.mxu1  ;;  %v634_v24 = vpop.f32.mrf.mxu0 }
 0x1f6   : > { %v640_v30 = vadd.f32 %v1233_v21, %v1223_v22 }
 0x1f7   : > { %v537_v23 = vpop.f32.mrf.mxu1  ;;  %v1236_v26 = vpop.f32.mrf.mxu0 }
 0x1f8   : > { %v635_v29 = vadd.f32 %v634_v24, %v537_v23 }
 0x1f9   : > { %v1226_v25 = vpop.f32.mrf.mxu1  ;;  %v644_v31 = vpop.f32.mrf.mxu0 }
 0x1fa   : > { %v650_v37 = vadd.f32 %v1236_v26, %v1226_v25 }
 0x1fb   : > { %v547_v27 = vpop.f32.mrf.mxu1 }
 0x1fc   : > { %v645_v36 = vadd.f32 %v644_v31, %v547_v27 }
 0x1fd   : > { %v1243_v28 = vpop.f32.mrf.mxu1 }
 0x1fe   : > { %v756_v34 = vadd.f32 %v1243_v28, %v640_v30 }
 0x1ff   : > { %v736_v32 = vpop.f32.mrf.mxu1 }
 0x200   : > { %v755_v33 = vadd.f32 %v736_v32, %v635_v29 }
 0x201   : > { %v1246_v35 = vpop.f32.mrf.mxu1 }
 0x202   : > { %1279 = vmatprep.mubr.f32.mxu0 %v755_v33  ;;  %v758_v40 = vadd.f32 %v1246_v35, %v650_v37 }
 0x203   : > { %v746_v38 = vpop.f32.mrf.mxu1  ;;  %1280 = vmatmul.mubr.f32.vlgmr.msra.gmra.mxu0 %v756_v34 }
 0x204   : > { %v757_v39 = vadd.f32 %v746_v38, %v645_v36 }
 0x206   : > { %1282 = vmatprep.mubr.f32.mxu0 %v757_v39 }
 0x207   : > { %1283 = vmatmul.mubr.f32.gmra.mxu0 %v758_v40 }
 0x2c3   : > { %v1281_v41 = vpop.f32.mrf.mxu0 }
 0x2c5   : > { %v825_v42 = vpop.f32.mrf.mxu0 }
 0x2c6   : > { %v844_v44 = vadd.f32 %v1281_v41, %v825_v42 }
 0x2c7   : > { %v1284_v43 = vpop.f32.mrf.mxu0 }
 0x2c9   : > { %v835_v45 = vpop.f32.mrf.mxu0 }
 0x2ca   : > { %v845_v46 = vadd.f32 %v844_v44, %v835_v45 }
 0x2cc   : > { %v846_v47 = vadd.f32 %v1284_v43, %v845_v46 }
 0x2ce   : > { %v847_v48 = vrot.slane %v846_v47, 4 }
 0x2d0   : > { %v848_v49 = vadd.f32 %v847_v48, %v846_v47 }
 0x2d2   : > { %v849_v50 = vrot.slane %v848_v49, 2 }
 0x2d4   : > { %v850_v51 = vadd.f32 %v849_v50, %v848_v49 }
 0x2d6   : > { %v851_v52 = vrot.slane %v850_v51, 1 }
 0x2d8   : > { %v852_v53 = vadd.f32 %v851_v52, %v850_v51 }
 0x2da   : > { %v853_v54 = vmul.f32 0.0009765625, %v852_v53 }
 0x2dc   : > { %v854_v55 = vsub.f32 %v755_v33, %v853_v54  ;;  %v855_v56 = vsub.f32 %v756_v34, %v853_v54  ;;  %v856_v57 = vsub.f32 %v757_v39, %v853_v54  ;;  %v857_v60 = vsub.f32 %v758_v40, %v853_v54 }
 0x2de   : > { %v858_v58 = vmul.f32 %v854_v55, %v854_v55  ;;  %v859_v59 = vmul.f32 %v855_v56, %v855_v56  ;;  %v860_v61 = vmul.f32 %v856_v57, %v856_v57  ;;  %v861_v62 = vmul.f32 %v857_v60, %v857_v60 }
 0x2e0   : > { %1317 = vmatprep.mubr.f32.mxu1 %v858_v58 }
 0x2e1   : > { %1318 = vmatmul.mubr.f32.vlgmr.msra.gmra.mxu1 %v859_v59 }
 0x2e2   : > { %1320 = vmatprep.mubr.f32.mxu1 %v860_v61 }
 0x2e5   : > { %1321 = vmatmul.mubr.f32.gmra.mxu1 %v861_v62 }
 0x3a1   : > { %v1319_v63 = vpop.f32.mrf.mxu1 }
 0x3a3   : > { %v928_v0 = vpop.f32.mrf.mxu1 }
 0x3a4   : > { %v947_v2 = vadd.f32 %v1319_v63, %v928_v0 }
 0x3a5   : > { %v1322_v1 = vpop.f32.mrf.mxu1 }
 0x3a7   : > { %v938_v3 = vpop.f32.mrf.mxu1 }
 0x3a8   : > { %v948_v4 = vadd.f32 %v947_v2, %v938_v3 }
 0x3aa   : > { %v949_v5 = vadd.f32 %v1322_v1, %v948_v4 }
 0x3ac   : > { %v950_v6 = vrot.slane %v949_v5, 4 }
 0x3ae   : > { %v951_v7 = vadd.f32 %v950_v6, %v949_v5 }
 0x3b0   : > { %v952_v8 = vrot.slane %v951_v7, 2 }
 0x3b2   : > { %v953_v9 = vadd.f32 %v952_v8, %v951_v7 }
 0x3b4   : > { %v954_v10 = vrot.slane %v953_v9, 1 }
 0x3b6   : > { %v955_v11 = vadd.f32 %v954_v10, %v953_v9 }
 0x3b8   : > { %v956_v12 = vmul.f32 0.0009765625, %v955_v11 }
 0x3ba   : > { %v957_v13 = vadd.f32 1e-05, %v956_v12 }
 0x3bc   : > { %1387 = vrsqrt.f32 %v957_v13 }
 0x3c9   : > { %v1388_v14 = vpop.eup %1387 }
 0x3ca   : > { %v959_v15 = vmul.f32 %v1388_v14, %v854_v55  ;;  %v960_v16 = vmul.f32 %v1388_v14, %v855_v56  ;;  %v961_v17 = vmul.f32 %v1388_v14, %v856_v57  ;;  %v962_v18 = vmul.f32 %v1388_v14, %v857_v60 }
 0x3cc   : > { %v963_v19 = vmax.f32 %v959_v15, 0.0  ;;  %v964_v20 = vmax.f32 %v960_v16, 0.0  ;;  %v965_v21 = vmax.f32 %v961_v17, 0.0  ;;  %v966_v22 = vmax.f32 %v962_v18, 0.0 }
 0x3ce   : > { %967 = vst [vmem:[%s230_s20] sm:$0xff] %v963_v19  ;;  %968 = vst [vmem:[%s230_s20 + $0x8] sm:$0xff] %v964_v20 }
 0x3cf   : > { %969 = vst [vmem:[%s230_s20 + $0x10] sm:$0xff] %v965_v21  ;;  %970 = vst [vmem:[%s230_s20 + $0x18] sm:$0xff] %v966_v22 }
 0x3d0   : > { %1456 = shalt.err (!%p1453_p0)
}
 0x3d1   : > { %s1457_s26 = scalar_lea.hbm %s1783_s7, 512  ;;  %s1461_s12 = scalar_lea.hbm %s1832_s4, 1024 }
 0x3d2   : > { %p1458_p5 = scmp.ne.s32.totalorder %s1783_s7, %s1457_s26  ;;  %p1462_p4 = scmp.lt.s32.totalorder %s1783_s7, %s1832_s4 }
 0x3d3   : > { %p1463_p6 = scmp.lt.s32.totalorder %s1461_s12, %s1457_s26 }
 0x3d4   : > { %p1459_p9 = pnand %p1458_p5, %p1848_p11 }
 0x3d5   : > { %p1464_p8 = por %p1463_p6, %p1462_p4 }
 0x3d6   : > { %p1460_p1 = pneg %p1459_p9 }
 0x3d8   : > { %p1465_p3 = pnand %p1464_p8, %p1460_p1 }
 0x3da   : > { %1468 = shalt.err (!%p1465_p3)
}
 0x3db   : > { %s1521_s14 = smov 128   ;;  %s1522_s20 = smov 8  }
 0x3dc   : > { %1329 = dma.vmem_to_hbm [thread:$0]  (%p1848_p11), %s1785_s25, 512, %s1783_s7, %s972_s19, %s1521_s14, %s1521_s14, %s1522_s20  }
 0x3dd PF: > { %s1000_s30 = sand.u32 1, %s1499_s15   ;;  %p1849_p7 = scmp.ne.s32.totalorder %s1838_s22, 0 }
 0x3de   : > { %p1850_p12 = scmp.ge.s32.totalorder %s1511_s18, 2  ;;  %s1001_s6 = scalar_lea.sflag [#allocation4], %s1000_s30 }
 0x3e0   : > { %p1340_p10 = pnand %p1850_p12, %p1849_p7 }
 0x3e2   : > { %p1341_p2 = pneg %p1340_p10 }
 0x3e4   : > { %1494 = dma.done.wait (%p1341_p2), %s1001_s6, 512  }
 0x3e5   : > { %1496 = vsyncadd (%p1341_p2), %s1001_s6, 4294966784  ;;  %p18_p13 = scmp.ge.s32.totalorder %s1602_s27, 4   ;;  %s1851_s15 = smov %s1503_s16 }
 0x3e6   : > { %s1852_s16 = smov %s1507_s17  ;;  %s1853_s17 = smov %s1619_s9 }
 0x3e7   : > { %s1854_s18 = smov %s1602_s27  ;;  %20 = sbr.rel (!%p18_p13) target bundleno = 6 (0x6), region = 87 }
 0x3ec   :  { %1006 = vsyncpa [#allocation3], 1 }
 0x3ed   :  { %1008 = vsyncpa [#allocation3 + $0x1], 1 }
 0x3ee   :  { %1009 = vsyncpa [#allocation6], 1 }
 0x3ef   :  { %1010 = vsyncpa [#allocation4], 1 }
 0x3f0   :  { %1012 = vsyncpa [#allocation4 + $0x1], 1 }

</bundles_post_ra>
